<compile_context>
chip_gen: v6e
topology: v6e:2x2x1
jax: 0.10.0
libtpu: 0.0.40
codegen_flags: <defaults>
</compile_context>

<pallas_src>
import jax
import jax.numpy as jnp
from jax.experimental import pallas as pl
from jax.experimental.pallas import tpu as pltpu


def _round_up(n, m):
    return ((n + m - 1) // m) * m


# --------------------------------------------------------------------------
# Kernels
# --------------------------------------------------------------------------
def _fc_dropout_train_kernel(x_ref, m_ref, w1_ref, b1_ref, w2_ref, b2_ref, o_ref):
    # layer 0: (TM, D0) @ (D0, D1p), f32 accumulation, bias + relu in f32
    h = jnp.dot(x_ref[...], w1_ref[...],
                preferred_element_type=jnp.float32) + b1_ref[...]
    h = jnp.maximum(h, 0.0)
    # inverted dropout: mask is {0,1}; the 1/(1-p) scale is folded into w2
    h = h * m_ref[...]
    # layer 1: (TM, D1p) @ (D1p, D2p)
    y = jnp.dot(h.astype(w2_ref.dtype), w2_ref[...],
                preferred_element_type=jnp.float32) + b2_ref[...]
    o_ref[...] = y.astype(o_ref.dtype)


def _fc_eval_kernel(x_ref, w1_ref, b1_ref, w2_ref, b2_ref, o_ref):
    h = jnp.dot(x_ref[...], w1_ref[...],
                preferred_element_type=jnp.float32) + b1_ref[...]
    h = jnp.maximum(h, 0.0)
    y = jnp.dot(h.astype(w2_ref.dtype), w2_ref[...],
                preferred_element_type=jnp.float32) + b2_ref[...]
    o_ref[...] = y.astype(o_ref.dtype)


# --------------------------------------------------------------------------
# Wrapper
# --------------------------------------------------------------------------
def fc_dropout_forward(x, params, key=None, *, p=0.5, dropout=True, tile_m=512):
    """x: (B, D0) float32.  params: (w1, b1, w2, b2) with w_i (in, out).
    key: jax PRNGKey used only when dropout=True and p > 0."""
    w1, b1, w2, b2 = params
    B, D0 = x.shape
    D1 = w1.shape[1]
    D2 = w2.shape[1]
    assert w1.shape == (D0, D1) and w2.shape == (D1, D2)

    LANE, SUBLANE = 128, 8
    D1p = _round_up(D1, LANE)   # 336 -> 384 : lane-dense hidden
    D2p = _round_up(D2, LANE)   # 42  -> 128 : lane-dense output (unmasked vst)

    # Batch tiling: single full-block for small B, 512-row tiles otherwise.
    TM = min(int(tile_m), _round_up(max(B, SUBLANE), SUBLANE))
    Bp = _round_up(B, TM)

    def _pad2d(a, shape, dtype):
        if a.shape == shape:
            return a.astype(dtype)
        out = jnp.zeros(shape, dtype)
        return out.at[: a.shape[0], : a.shape[1]].set(a.astype(dtype))

    # ---- operand prep (wrapper side, plain XLA ops) ----------------------
    xp = _pad2d(x, (Bp, D0), jnp.bfloat16)
    w1p = _pad2d(w1, (D0, D1p), jnp.bfloat16)
    b1p = _pad2d(b1.reshape(1, D1), (1, D1p), jnp.float32)

    w2_eff = w2.astype(jnp.float32)
    use_dropout = bool(dropout) and p > 0.0
    if use_dropout:
        w2_eff = w2_eff * jnp.float32(1.0 / (1.0 - p))  # fold inverted-dropout scale
    w2p = _pad2d(w2_eff, (D1p, D2p), jnp.bfloat16)
    b2p = _pad2d(b2.reshape(1, D2), (1, D2p), jnp.float32)

    # ---- specs -----------------------------------------------------------
    grid = (Bp // TM,)
    x_spec = pl.BlockSpec((TM, D0), lambda i: (i, 0))
    o_spec = pl.BlockSpec((TM, D2p), lambda i: (i, 0))
    w1_spec = pl.BlockSpec((D0, D1p), lambda i: (0, 0))   # weight-resident
    b1_spec = pl.BlockSpec((1, D1p), lambda i: (0, 0))
    w2_spec = pl.BlockSpec((D1p, D2p), lambda i: (0, 0))
    b2_spec = pl.BlockSpec((1, D2p), lambda i: (0, 0))
    out_shape = jax.ShapeDtypeStruct((Bp, D2p), jnp.float32)
    cparams = pltpu.CompilerParams(dimension_semantics=("parallel",))

    if use_dropout:
        assert key is not None, "dropout=True requires a PRNG key"
        keep = jax.random.bernoulli(key, 1.0 - p, (B, D1))
        maskp = _pad2d(keep, (Bp, D1p), jnp.bfloat16)
        m_spec = pl.BlockSpec((TM, D1p), lambda i: (i, 0))
        out = pl.pallas_call(
            _fc_dropout_train_kernel,
            grid=grid,
            in_specs=[x_spec, m_spec, w1_spec, b1_spec, w2_spec, b2_spec],
            out_specs=o_spec,
            out_shape=out_shape,
            compiler_params=cparams,
        )(xp, maskp, w1p, b1p, w2p, b2p)
    else:
        out = pl.pallas_call(
            _fc_eval_kernel,
            grid=grid,
            in_specs=[x_spec, w1_spec, b1_spec, w2_spec, b2_spec],
            out_specs=o_spec,
            out_shape=out_shape,
            compiler_params=cparams,
        )(xp, w1p, b1p, w2p, b2p)

    return out[:B, :D2]


def init_params(key, D=(168, 336, 42)):
    """Deterministic init mimicking nn.Linear default (uniform +-1/sqrt(fan_in))."""
    params = []
    for i in range(len(D) - 1):
        fan_in, fan_out = D[i], D[i + 1]
        key, kw, kb = jax.random.split(key, 3)
        bound = 1.0 / jnp.sqrt(fan_in)
        w = jax.random.uniform(kw, (fan_in, fan_out), jnp.float32, -bound, bound)
        b = jax.random.uniform(kb, (fan_out,), jnp.float32, -bound, bound)
        params.extend([w, b])
    return tuple(params)


# --------------------------------------------------------------------------
# Demo / self-check
# --------------------------------------------------------------------------
if __name__ == "__main__":
    D = (168, 336, 42)
    B = 8

    key = jax.random.PRNGKey(0)
    key, kx, kdrop = jax.random.split(key, 3)
    x = jax.random.normal(kx, (B, D[0]), dtype=jnp.float32)
    params = init_params(jax.random.PRNGKey(0), D)
    w1, b1, w2, b2 = params

    # --- train path (dropout enabled) -------------------------------------
    out_train = jax.block_until_ready(
        fc_dropout_forward(x, params, kdrop, p=0.5, dropout=True))
    assert out_train.shape == (B, D[-1]) and out_train.dtype == jnp.float32

    # Reference using the same keep-mask the wrapper draws (bf16 matmul inputs,
    # f32 accumulation, 1/(1-p) folded into w2 -- mirrors kernel numerics).
    keep = jax.random.bernoulli(kdrop, 0.5, (B, D[1])).astype(jnp.float32)
    h = jnp.dot(x.astype(jnp.bfloat16), w1.astype(jnp.bfloat16),
                preferred_element_type=jnp.float32) + b1
    h = jnp.maximum(h, 0.0) * keep
    ref_train = jnp.dot(h.astype(jnp.bfloat16),
                        (w2 * 2.0).astype(jnp.bfloat16),
                        preferred_element_type=jnp.float32) + b2
    assert jnp.allclose(out_train, ref_train, atol=2e-2, rtol=2e-2), (
        "train-path mismatch")

    # --- eval path (dropout disabled) --------------------------------------
    out_eval = jax.block_until_ready(
        fc_dropout_forward(x, params, None, p=0.5, dropout=False))
    h = jnp.maximum(
        jnp.dot(x.astype(jnp.bfloat16), w1.astype(jnp.bfloat16),
                preferred_element_type=jnp.float32) + b1, 0.0)
    ref_eval = jnp.dot(h.astype(jnp.bfloat16), w2.astype(jnp.bfloat16),
                       preferred_element_type=jnp.float32) + b2
    assert jnp.allclose(out_eval, ref_eval, atol=2e-2, rtol=2e-2), (
        "eval-path mismatch")

    print("KERNEL_OK")
</pallas_src>

<mosaic_0001>
module attributes {stable_mosaic.version = 11 : i64} {
  func.func @_fc_dropout_train_kernel(%arg0: i32, %arg1: memref<8x168xbf16, #tpu.memory_space<vmem>>, %arg2: memref<8x384xbf16, #tpu.memory_space<vmem>>, %arg3: memref<168x384xbf16, #tpu.memory_space<vmem>>, %arg4: memref<1x384xf32, #tpu.memory_space<vmem>>, %arg5: memref<384x128xbf16, #tpu.memory_space<vmem>>, %arg6: memref<1x128xf32, #tpu.memory_space<vmem>>, %arg7: memref<8x128xf32, #tpu.memory_space<vmem>>) attributes {dimension_semantics = [#tpu.dimension_semantics<parallel>], iteration_bounds = array<i64: 1>, scalar_prefetch = 0 : i64, scratch_operands = 0 : i64, tpu.core_type = #tpu.core_type<tc>, window_params = [{transform_indices = @transform_0, window_bounds = array<i64: 8, 168>}, {transform_indices = @transform_1, window_bounds = array<i64: 8, 384>}, {pipeline_mode = #tpu.pipeline_mode<synchronous>, transform_indices = @transform_2, window_bounds = array<i64: 168, 384>}, {pipeline_mode = #tpu.pipeline_mode<synchronous>, transform_indices = @transform_3, window_bounds = array<i64: 1, 384>}, {pipeline_mode = #tpu.pipeline_mode<synchronous>, transform_indices = @transform_4, window_bounds = array<i64: 384, 128>}, {pipeline_mode = #tpu.pipeline_mode<synchronous>, transform_indices = @transform_5, window_bounds = array<i64: 1, 128>}, {transform_indices = @transform_6, window_bounds = array<i64: 8, 128>}]} {
    %c0 = arith.constant 0 : index
    %c0_0 = arith.constant 0 : index
    %0 = vector.load %arg1[%c0, %c0_0] : memref<8x168xbf16, #tpu.memory_space<vmem>>, vector<8x168xbf16>
    %c0_1 = arith.constant 0 : index
    %c0_2 = arith.constant 0 : index
    %1 = vector.load %arg3[%c0_1, %c0_2] : memref<168x384xbf16, #tpu.memory_space<vmem>>, vector<168x384xbf16>
    %cst = arith.constant dense<0.000000e+00> : vector<8x384xf32>
    %2 = tpu.matmul %0, %1, %cst {dimension_numbers = #tpu.dot_dimension_numbers<[1], [0], [0], [1], [0, 0, 1, 1], [], []>} : vector<8x168xbf16>, vector<168x384xbf16>, vector<8x384xf32> -> vector<8x384xf32>
    %c0_3 = arith.constant 0 : index
    %c0_4 = arith.constant 0 : index
    %3 = vector.load %arg4[%c0_3, %c0_4] : memref<1x384xf32, #tpu.memory_space<vmem>>, vector<1x384xf32>
    %4 = vector.broadcast %3 : vector<1x384xf32> to vector<8x384xf32>
    %5 = arith.addf %2, %4 : vector<8x384xf32>
    %cst_5 = arith.constant 0.000000e+00 : f32
    %6 = vector.broadcast %cst_5 : f32 to vector<8x384xf32>
    %7 = arith.maximumf %5, %6 : vector<8x384xf32>
    %c0_6 = arith.constant 0 : index
    %c0_7 = arith.constant 0 : index
    %8 = vector.load %arg2[%c0_6, %c0_7] : memref<8x384xbf16, #tpu.memory_space<vmem>>, vector<8x384xbf16>
    %9 = arith.extf %8 : vector<8x384xbf16> to vector<8x384xf32>
    %10 = arith.mulf %7, %9 : vector<8x384xf32>
    %11 = arith.truncf %10 : vector<8x384xf32> to vector<8x384xbf16>
    %c0_8 = arith.constant 0 : index
    %c0_9 = arith.constant 0 : index
    %12 = vector.load %arg5[%c0_8, %c0_9] : memref<384x128xbf16, #tpu.memory_space<vmem>>, vector<384x128xbf16>
    %cst_10 = arith.constant dense<0.000000e+00> : vector<8x128xf32>
    %13 = tpu.matmul %11, %12, %cst_10 {dimension_numbers = #tpu.dot_dimension_numbers<[1], [0], [0], [1], [0, 0, 1, 1], [], []>} : vector<8x384xbf16>, vector<384x128xbf16>, vector<8x128xf32> -> vector<8x128xf32>
    %c0_11 = arith.constant 0 : index
    %c0_12 = arith.constant 0 : index
    %14 = vector.load %arg6[%c0_11, %c0_12] : memref<1x128xf32, #tpu.memory_space<vmem>>, vector<1x128xf32>
    %15 = vector.broadcast %14 : vector<1x128xf32> to vector<8x128xf32>
    %16 = arith.addf %13, %15 : vector<8x128xf32>
    %c0_13 = arith.constant 0 : index
    %c0_14 = arith.constant 0 : index
    %17 = vector.load %arg7[%c0_13, %c0_14] : memref<8x128xf32, #tpu.memory_space<vmem>>, vector<8x128xf32>
    tpu.vector_store %arg7[%c0_13, %c0_14], %16 {strides = array<i32>} : memref<8x128xf32, #tpu.memory_space<vmem>>, vector<8x128xf32>,
    return
  }
  func.func @transform_0(%arg0: i32) -> (i32, i32) {
    %c0_i32 = arith.constant 0 : i32
    %c0_i32_0 = arith.constant 0 : i32
    return %arg0, %c0_i32 : i32, i32
  }
  func.func @transform_1(%arg0: i32) -> (i32, i32) {
    %c0_i32 = arith.constant 0 : i32
    %c0_i32_0 = arith.constant 0 : i32
    return %arg0, %c0_i32 : i32, i32
  }
  func.func @transform_2(%arg0: i32) -> (i32, i32) {
    %c0_i32 = arith.constant 0 : i32
    %c0_i32_0 = arith.constant 0 : i32
    %c0_i32_1 = arith.constant 0 : i32
    return %c0_i32, %c0_i32_0 : i32, i32
  }
  func.func @transform_3(%arg0: i32) -> (i32, i32) {
    %c0_i32 = arith.constant 0 : i32
    %c0_i32_0 = arith.constant 0 : i32
    %c0_i32_1 = arith.constant 0 : i32
    return %c0_i32, %c0_i32_0 : i32, i32
  }
  func.func @transform_4(%arg0: i32) -> (i32, i32) {
    %c0_i32 = arith.constant 0 : i32
    %c0_i32_0 = arith.constant 0 : i32
    %c0_i32_1 = arith.constant 0 : i32
    return %c0_i32, %c0_i32_0 : i32, i32
  }
  func.func @transform_5(%arg0: i32) -> (i32, i32) {
    %c0_i32 = arith.constant 0 : i32
    %c0_i32_0 = arith.constant 0 : i32
    %c0_i32_1 = arith.constant 0 : i32
    return %c0_i32, %c0_i32_0 : i32, i32
  }
  func.func @transform_6(%arg0: i32) -> (i32, i32) {
    %c0_i32 = arith.constant 0 : i32
    %c0_i32_0 = arith.constant 0 : i32
    return %arg0, %c0_i32 : i32, i32
  }
}

</mosaic_0001>

<bundles_post_ra>
// kernel: tpu_custom_call.1
= control target key start
LH: loop header
LB: loop body
LE: loop exit
PB: predicated region body
PF: predicated region fallthrough
CT: control target
= control target key end

     0   :  { %11 = vsyncpa [#allocation3], 0  ;;  %s1101_s0 = inlined_call_operand.hbm [shape: bf16[8,168], index: 0, kind: input, shape index: {}]   ;;  %s1102_s1 = inlined_call_operand.hbm [shape: bf16[8,384], index: 1, kind: input, shape index: {}]   ;;  %s1103_s2 = inlined_call_operand.hbm [shape: bf16[168,384], index: 2, kind: input, shape index: {}]   ;;  %s1104_s3 = inlined_call_operand.vmem [shape: f32[1,384], index: 3, kind: input, shape index: {}]   ;;  %s1105_s4 = inlined_call_operand.hbm [shape: bf16[384,128], index: 4, kind: input, shape index: {}]   ;;  %s1106_s5 = inlined_call_operand.vmem [shape: f32[1,128], index: 5, kind: input, shape index: {}]   ;;  %s1107_s6 = inlined_call_operand.hbm [shape: f32[8,128], index: 6, kind: output, shape index: {}]  }
   0x1   :  { %12 = vsyncpa [#allocation6], 0 }
   0x2   :  { %13 = vsyncpa [#allocation9], 0 }
   0x3   :  { %14 = vsyncpa [#allocation4], 0  ;;  %s1019_s21 = smov [#allocation5]   ;;  %s1020_s23 = smov [#allocation2]  }
   0x4   :  { %s31_s22 = sshll.u32 %s1019_s21, 4  ;;  %s21_s24 = sshll.u32 %s1020_s23, 4  ;;  %s32_s22 = int_to_ptr.vmem [resolvable:$true] %s31_s22  ;;  %s22_s24 = int_to_ptr.vmem [resolvable:$true] %s21_s24 }
   0x5   :  { %s919_s25 = scalar_lea.vmem %s32_s22, 192  ;;  %p924_p1 = scmp.lt.s32.totalorder %s32_s22, %s32_s22 }
   0x6   :  { %p920_p0 = scmp.ne.s32.totalorder %s32_s22, %s919_s25  ;;  %p925_p2 = scmp.lt.s32.totalorder %s919_s25, %s919_s25 }
   0x8   :  { %p926_p3 = por %p925_p2, %p924_p1 }
   0xa   :  { %p927_p4 = pnand %p926_p3, %p920_p0 }
   0xc   :  { %930 = shalt.err (!%p927_p4)
}
   0xd   :  { %34 = dma.hbm_to_vmem [thread:$0]  %s1102_s1, 192, %s32_s22, [#allocation6]  }
   0xe   :  { %s939_s28 = scalar_lea.vmem %s22_s24, 128  ;;  %p944_p6 = scmp.lt.s32.totalorder %s22_s24, %s22_s24 }
   0xf   :  { %p940_p5 = scmp.ne.s32.totalorder %s22_s24, %s939_s28  ;;  %p945_p7 = scmp.lt.s32.totalorder %s939_s28, %s939_s28 }
  0x11   :  { %p946_p8 = por %p945_p7, %p944_p6 }
  0x13   :  { %p947_p9 = pnand %p946_p8, %p940_p5 }
  0x15   :  { %950 = shalt.err (!%p947_p9)
}
  0x16   :  { %24 = dma.hbm_to_vmem [thread:$0]  %s1101_s0, 128, %s22_s24, [#allocation3]  }
  0x17   :  { %s1021_s7 = smov [#allocation7]  }
  0x18   :  { %s40_s8 = sshll.u32 %s1021_s7, 4  ;;  %s41_s8 = int_to_ptr.vmem [resolvable:$true] %s40_s8 }
  0x19   :  { %s959_s9 = scalar_lea.vmem %s41_s8, 4032  ;;  %p964_p11 = scmp.lt.s32.totalorder %s41_s8, %s41_s8 }
  0x1a   :  { %p960_p10 = scmp.ne.s32.totalorder %s41_s8, %s959_s9  ;;  %p965_p12 = scmp.lt.s32.totalorder %s959_s9, %s959_s9 }
  0x1c   :  { %p966_p13 = por %p965_p12, %p964_p11 }
  0x1e   :  { %p967_p0 = pnand %p966_p13, %p960_p10 }
  0x20   :  { %970 = shalt.err (!%p967_p0)
}
  0x21   :  { %s1022_s1 = smov 192   ;;  %s1023_s10 = smov 12  }
  0x22   :  { %46 = dma.hbm_to_vmem [thread:$0]  %s1103_s2, 4032, %s41_s8, [#allocation6], %s1022_s1, %s1022_s1, %s1023_s10  }
  0x23   :  { %s1024_s13 = smov [#allocation8]  }
  0x24   :  { %s54_s14 = sshll.u32 %s1024_s13, 4  ;;  %s55_s14 = int_to_ptr.vmem [resolvable:$true] %s54_s14 }
  0x25   :  { %s979_s0 = scalar_lea.vmem %s55_s14, 3072  ;;  %p984_p2 = scmp.lt.s32.totalorder %s55_s14, %s55_s14 }
  0x26   :  { %p980_p1 = scmp.ne.s32.totalorder %s55_s14, %s979_s0  ;;  %p985_p3 = scmp.lt.s32.totalorder %s979_s0, %s979_s0 }
  0x28   :  { %p986_p4 = por %p985_p3, %p984_p2 }
  0x2a   :  { %p987_p5 = pnand %p986_p4, %p980_p1 }
  0x2c   :  { %990 = shalt.err (!%p987_p5)
}
  0x2d   :  { %s1025_s15 = smov 64   ;;  %s1026_s16 = smov 4  }
  0x2e   :  { %60 = dma.hbm_to_vmem [thread:$0]  %s1105_s4, 3072, %s55_s14, [#allocation9], %s1025_s15, %s1025_s15, %s1026_s16  }
  0x2f   :  { %1011 = dma.done.wait [#allocation3], 128  }
  0x30   :  { %1012 = vsyncadd [#allocation3], 4294967168 }
  0x31   :  { %1013 = dma.done.wait [#allocation6], 4224  }
  0x32   :  { %1014 = vsyncadd [#allocation6], 4294963072 }
  0x33   :  { %1015 = dma.done.wait [#allocation9], 3072  }
  0x34   :  { %1016 = vsyncadd [#allocation9], 4294964224  ;;  %v1027_v0 = vmov 0   ;;  %v842_v1 = vld [vmem:[#allocation7 + $0xac] ss:$12 sps:$4 sm:$0xff]   ;;  %vm310_vm0 = vcmask 326656  }
  0x35   :  { %365 = vmatprep.subr.bf16.mxu1 %v1027_v0  ;;  %v844_v2 = vld [vmem:[#allocation7 + $0xa8] ss:$12 sps:$4 sm:$0xff]   ;;  %324 = vmatprep.subr.bf16.mxu0 %v842_v1  ;;  %v845_v3 = vld [vmem:[#allocation7 + $0xb0] ss:$12 sps:$4 sm:$0xff]   ;;  %v849_v6 = vld [vmem:[#allocation7 + $0x98] ss:$12 sps:$4 sm:$0xff]   ;;  %v121_v1 = vlaneseq }
  0x36   :  { %325 = vmatpush1.bf16.msra.mxu0 %v844_v2  ;;  %v846_v4 = vld [vmem:[#allocation7 + $0x94] ss:$12 sps:$4 sm:$0xff]   ;;  %v848_v5 = vld [vmem:[#allocation7 + $0x90] ss:$12 sps:$4 sm:$0xff]   ;;  %366 = vmatpush1.bf16.msra.mxu1 %v845_v3  ;;  %v852_v8 = vld [vmem:[#allocation7 + $0x78] ss:$12 sps:$4 sm:$0xff]  }
  0x37   :  { %326 = vmatprep.subr.bf16.mxu0 %v846_v4  ;;  %367 = vmatprep.subr.bf16.mxu1 %v1027_v0  ;;  %v850_v7 = vld [vmem:[#allocation7 + $0x7c] ss:$12 sps:$4 sm:$0xff]   ;;  %v853_v9 = vld [vmem:[#allocation7 + $0x80] ss:$12 sps:$4 sm:$0xff]   ;;  %v854_v10 = vld [vmem:[#allocation7 + $0x64] ss:$12 sps:$4 sm:$0xff]  }
  0x38   :  { %v856_v11 = vld [vmem:[#allocation7 + $0x60] ss:$12 sps:$4 sm:$0xff]   ;;  %v857_v12 = vld [vmem:[#allocation7 + $0x68] ss:$12 sps:$4 sm:$0xff]   ;;  %v861_v15 = vld [vmem:[#allocation7 + $0x50] ss:$12 sps:$4 sm:$0xff]  }
  0x39   :  { %v858_v13 = vld [vmem:[#allocation7 + $0x4c] ss:$12 sps:$4 sm:$0xff]   ;;  %v860_v14 = vld [vmem:[#allocation7 + $0x48] ss:$12 sps:$4 sm:$0xff]   ;;  %v864_v17 = vld [vmem:[#allocation7 + $0x30] ss:$12 sps:$4 sm:$0xff]  }
  0x3a   :  { %327 = vmatpush1.bf16.msra.mxu0 %v848_v5  ;;  %368 = vmatpush1.bf16.msra.mxu1 %v849_v6  ;;  %v862_v16 = vld [vmem:[#allocation7 + $0x34] ss:$12 sps:$4 sm:$0xff]   ;;  %v865_v18 = vld [vmem:[#allocation7 + $0x38] ss:$12 sps:$4 sm:$0xff]   ;;  %v866_v19 = vld [vmem:[#allocation7 + $0x1c] ss:$12 sps:$4 sm:$0xff]  }
  0x3b   :  { %328 = vmatprep.subr.bf16.mxu0 %v850_v7  ;;  %369 = vmatprep.subr.bf16.mxu1 %v1027_v0  ;;  %v868_v20 = vld [vmem:[#allocation7 + $0x18] ss:$12 sps:$4 sm:$0xff]   ;;  %v869_v21 = vld [vmem:[#allocation7 + $0x20] ss:$12 sps:$4 sm:$0xff]   ;;  %v117_v24 = vld [vmem:[#allocation7 + $0xf0] sm:$0xff]  ;;  %vm314_vm1 = vcmask 1043456  }
  0x3c   :  { %v870_v22 = vld [vmem:[#allocation7 + $0x4] ss:$12 sps:$4 sm:$0xff]   ;;  %v872_v26 = vld [vmem:[#allocation7] ss:$12 sps:$4 sm:$0xff]   ;;  %v873_v27 = vld [vmem:[#allocation7 + $0x8] ss:$12 sps:$4 sm:$0xff]   ;;  %v749_v28 = vcombine.high %v117_v24, %v117_v24  ;;  %v748_v29 = vcombine.low %v117_v24, %v117_v24 }
  0x3d   :  { %v76_v23 = vld [vmem:[#allocation2] sm:$0xff]  ;;  %v876_v30 = vld [vmem:[#allocation7 + $0xf8] ss:$0 sps:$4 sm:$0xff]   ;;  %v877_v31 = vld [vmem:[#allocation7 + $0xdc] ss:$12 sps:$4 sm:$0xff]   ;;  %v1028_v44 = vmov 0.0  }
  0x3e   :  { %329 = vmatpush1.bf16.msra.mxu0 %v852_v8  ;;  %370 = vmatpush1.bf16.msra.mxu1 %v853_v9  ;;  %v717_v25 = vcombine.high %v76_v23, %v76_v23  ;;  %v316_v32 = vsel %vm314_vm1, %v748_v29, 0  ;;  %v322_v33 = vsel %vm314_vm1, %v876_v30, 0  ;;  %v879_v34 = vld [vmem:[#allocation7 + $0xd8] ss:$12 sps:$4 sm:$0xff]   ;;  %v880_v35 = vld [vmem:[#allocation7 + $0xe0] ss:$12 sps:$4 sm:$0xff]   ;;  %v716_v41 = vcombine.low %v76_v23, %v76_v23 }
  0x3f   :  { %330 = vmatprep.subr.bf16.mxu0 %v854_v10  ;;  %371 = vmatprep.subr.bf16.mxu1 %v1027_v0  ;;  %v881_v36 = vld [vmem:[#allocation7 + $0xc4] ss:$12 sps:$4 sm:$0xff]   ;;  %v883_v37 = vld [vmem:[#allocation7 + $0xc0] ss:$12 sps:$4 sm:$0xff]   ;;  %v884_v38 = vld [vmem:[#allocation7 + $0xc8] ss:$12 sps:$4 sm:$0xff]  }
  0x40   :  { %752 = vmatprep.mubr.msk.bf16.mxu0 %vm310_vm0, %v717_v25  ;;  %753 = vmatprep.mubr.msk.bf16.mxu1 %vm310_vm0, %v717_v25  ;;  %v888_v39 = vld [vmem:[#allocation8 + $0x78] sm:$0xff]   ;;  %v891_v43 = vld [vmem:[#allocation8 + $0x70] sm:$0xff]   ;;  %v894_v47 = vld [vmem:[#allocation8 + $0x68] sm:$0xff]   ;;  %vm1029_vm2 = vmmov 0   ;;  %v122_v2 = vshrl.u32 %v121_v1, 7  ;;  %s1030_s20 = smov [#allocation10]  }
  0x41   :  { %v889_v40 = vld [vmem:[#allocation8 + $0x38] sm:$0xff]   ;;  %v892_v45 = vld [vmem:[#allocation8 + $0x30] sm:$0xff]   ;;  %v895_v48 = vld [vmem:[#allocation8 + $0x28] sm:$0xff]   ;;  %s705_s21 = sshll.u32 %s1030_s20, 4  ;;  %s706_s21 = int_to_ptr.vmem [resolvable:$true] %s705_s21 }
  0x42   :  { %331 = vmatpush1.bf16.msra.mxu0 %v856_v11  ;;  %372 = vmatpush1.bf16.msra.mxu1 %v857_v12  ;;  %v887_v42 = vld [vmem:[#allocation8 + $0xb8] sm:$0xff]   ;;  %v890_v46 = vld [vmem:[#allocation8 + $0xb0] sm:$0xff]   ;;  %v893_v49 = vld [vmem:[#allocation8 + $0xa8] sm:$0xff]   ;;  %v123_v3 = vsub.s32 0, %v122_v2  ;;  %v131_v5 = vsub.s32 2, %v122_v2  ;;  %v127_v6 = vsub.s32 1, %v122_v2  ;;  %p996_p7 = scmp.lt.s32.totalorder %s706_s21, %s706_s21 }
  0x43   :  { %332 = vmatprep.subr.bf16.mxu0 %v858_v13  ;;  %373 = vmatprep.subr.bf16.mxu1 %v1027_v0  ;;  %v897_v50 = vld [vmem:[#allocation8 + $0x60] sm:$0xff]   ;;  %v900_v53 = vld [vmem:[#allocation8 + $0x58] sm:$0xff]   ;;  %v902_v56 = vld [vmem:[#allocation8 + $0x90] sm:$0xff]   ;;  %s991_s22 = scalar_lea.vmem %s706_s21, 128 }
  0x44   :  { %v898_v51 = vld [vmem:[#allocation8 + $0x20] sm:$0xff]   ;;  %v901_v54 = vld [vmem:[#allocation8 + $0x18] sm:$0xff]   ;;  %v903_v57 = vld [vmem:[#allocation8 + $0x50] sm:$0xff]   ;;  %p992_p6 = scmp.ne.s32.totalorder %s706_s21, %s991_s22  ;;  %p997_p8 = scmp.lt.s32.totalorder %s991_s22, %s991_s22 }
  0x45   :  { %v896_v52 = vld [vmem:[#allocation8 + $0xa0] sm:$0xff]   ;;  %v899_v55 = vld [vmem:[#allocation8 + $0x98] sm:$0xff]   ;;  %v904_v58 = vld [vmem:[#allocation8 + $0x10] sm:$0xff]  }
  0x46   :  { %333 = vmatpush1.bf16.msra.mxu0 %v860_v14  ;;  %374 = vmatpush1.bf16.msra.mxu1 %v861_v15  ;;  %v905_v59 = vld [vmem:[#allocation8 + $0x88] sm:$0xff]   ;;  %v908_v62 = vld [vmem:[#allocation8 + $0x80] sm:$0xff]   ;;  %v119_v4 = vld [vmem:[%s1104_s3] sm:$0x7]  ;;  %p998_p9 = por %p997_p8, %p996_p7 }
  0x47   :  { %334 = vmatprep.subr.bf16.mxu0 %v862_v16  ;;  %375 = vmatprep.subr.bf16.mxu1 %v1027_v0  ;;  %v906_v60 = vld [vmem:[#allocation8 + $0x48] sm:$0xff]   ;;  %v909_v63 = vld [vmem:[#allocation8 + $0x40] sm:$0xff]   ;;  %v124_v7 = vrot.slane %v119_v4, %v123_v3  ;;  %v132_v8 = vrot.slane %v119_v4, %v131_v5  ;;  %v408_v9 = vld [vmem:[#allocation5] sm:$0xff]  ;;  %v128_v11 = vrot.slane %v119_v4, %v127_v6 }
  0x48   :  { %v907_v61 = vld [vmem:[#allocation8 + $0x8] sm:$0xff]   ;;  %v409_v10 = vld [vmem:[#allocation5 + $0x8] sm:$0xf]  ;;  %v410_v15 = vunpack.c.l.bf16 %v408_v9  ;;  %p999_p10 = pnand %p998_p9, %p992_p6 }
  0x4a   :  { %335 = vmatpush1.bf16.msra.mxu0 %v864_v17  ;;  %376 = vmatpush1.bf16.msra.mxu1 %v865_v18  ;;  %v412_v17 = vunpack.c.l.bf16 %v409_v10 }
  0x4b   :  { %336 = vmatprep.subr.bf16.mxu0 %v866_v19  ;;  %377 = vmatprep.subr.bf16.mxu1 %v1027_v0 }
  0x4e   :  { %337 = vmatpush1.bf16.msra.mxu0 %v868_v20  ;;  %378 = vmatpush1.bf16.msra.mxu1 %v869_v21  ;;  %v411_v21 = vunpack.c.h.bf16 %v408_v9 }
  0x4f   :  { %338 = vmatprep.subr.bf16.mxu0 %v870_v22  ;;  %379 = vmatprep.subr.bf16.mxu1 %v1027_v0 }
  0x52   :  { %339 = vmatpush1.bf16.msra.mxu0 %v872_v26  ;;  %380 = vmatpush1.bf16.msra.mxu1 %v873_v27 }
  0x53   :  { %751 = vmatprep.subr.msk.bf16.mxu0 %vm314_vm1, %v749_v28  ;;  %391 = vmatprep.subr.bf16.mxu1 %v1027_v0 }
  0x56   :  { %351 = vmatpush2.bf16.msra.mxu0 %v316_v32  ;;  %392 = vmatpush2.bf16.msra.mxu1 %v322_v33 }
  0x57   :  { %352 = vmatprep.subr.bf16.mxu0 %v877_v31  ;;  %393 = vmatprep.subr.bf16.mxu1 %v1027_v0 }
  0x5a   :  { %353 = vmatpush2.bf16.msra.mxu0 %v879_v34  ;;  %394 = vmatpush2.bf16.msra.mxu1 %v880_v35 }
  0x5b   :  { %354 = vmatprep.subr.bf16.mxu0 %v881_v36  ;;  %395 = vmatprep.subr.bf16.mxu1 %v1027_v0  ;;  %v910_v0 = vld [vmem:[#allocation8] sm:$0xff]  }
  0x5e   :  { %355 = vmatpush2.bf16.msra.mxu0 %v883_v37  ;;  %396 = vmatpush2.bf16.msra.mxu1 %v884_v38  ;;  %v754_v38 = vld [vmem:[%s1106_s5] ss:$0 sm:$0xff] }
  0x5f   :  { %779 = vmatprep.subr.bf16.mxu0 %v888_v39  ;;  %810 = vmatprep.subr.bf16.mxu1 %v1028_v44 }
  0x61   :  { %357 = vmatmul.mubr.bf16.vlgmr.msra.gmra.mxu0 %v716_v41  ;;  %398 = vmatmul.mubr.bf16.vlgmr.msra.gmra.mxu1 %v716_v41 }
  0x62   :  { %780 = vmatpush3.bf16.msra.mxu0 %v889_v40  ;;  %811 = vmatpush3.bf16.msra.mxu1 %v887_v42 }
  0x63   :  { %781 = vmatprep.subr.bf16.mxu0 %v891_v43  ;;  %812 = vmatprep.subr.bf16.mxu1 %v1028_v44 }
  0x64   :  { %826 = vmatprep.mubr.msk.bf16.mxu1 %vm1029_vm2, %v1028_v44 }
  0x66   :  { %782 = vmatpush3.bf16.msra.mxu0 %v892_v45  ;;  %813 = vmatpush3.bf16.msra.mxu1 %v890_v46 }
  0x67   :  { %783 = vmatprep.subr.bf16.mxu0 %v894_v47  ;;  %814 = vmatprep.subr.bf16.mxu1 %v1028_v44 }
  0x6a   :  { %784 = vmatpush3.bf16.msra.mxu0 %v895_v48  ;;  %815 = vmatpush3.bf16.msra.mxu1 %v893_v49 }
  0x6b   :  { %785 = vmatprep.subr.bf16.mxu0 %v897_v50  ;;  %816 = vmatprep.subr.bf16.mxu1 %v1028_v44 }
  0x6e   :  { %786 = vmatpush3.bf16.msra.mxu0 %v898_v51  ;;  %817 = vmatpush3.bf16.msra.mxu1 %v896_v52 }
  0x6f   :  { %787 = vmatprep.subr.bf16.mxu0 %v900_v53  ;;  %818 = vmatprep.subr.bf16.mxu1 %v1028_v44 }
  0x72   :  { %788 = vmatpush3.bf16.msra.mxu0 %v901_v54  ;;  %819 = vmatpush3.bf16.msra.mxu1 %v899_v55 }
  0x73   :  { %820 = vmatprep.subr.bf16.mxu1 %v1028_v44  ;;  %789 = vmatprep.subr.bf16.mxu0 %v903_v57 }
  0x76   :  { %821 = vmatpush3.bf16.msra.mxu1 %v902_v56  ;;  %790 = vmatpush3.bf16.msra.mxu0 %v904_v58 }
  0x77   :  { %822 = vmatprep.subr.bf16.mxu1 %v1028_v44  ;;  %791 = vmatprep.subr.bf16.mxu0 %v906_v60 }
  0x7a   :  { %823 = vmatpush3.bf16.msra.mxu1 %v905_v59  ;;  %792 = vmatpush3.bf16.msra.mxu0 %v907_v61 }
  0x7b   :  { %824 = vmatprep.subr.bf16.mxu1 %v1028_v44  ;;  %793 = vmatprep.subr.bf16.mxu0 %v909_v63 }
  0x7e   :  { %825 = vmatpush3.bf16.msra.mxu1 %v908_v62  ;;  %794 = vmatpush3.bf16.msra.mxu0 %v910_v0 }
 0x121   :  { %v358_v12 = vpop.f32.mrf.mxu0  ;;  %v399_v14 = vpop.f32.mrf.mxu1 }
 0x122   :  { %v359_v13 = vadd.f32 %v358_v12, %v124_v7  ;;  %v400_v16 = vadd.f32 %v399_v14, %v132_v8 }
 0x123   :  { %v360_v18 = vpop.f32.mrf.mxu0  ;;  %v401_v22 = vpop.f32.mrf.mxu1 }
 0x124   :  { %v405_v19 = vmax.f32 %v359_v13, 0.0  ;;  %v361_v20 = vadd.f32 %v360_v18, %v128_v11  ;;  %v407_v23 = vmax.f32 %v400_v16, 0.0 }
 0x125   :  { %v362_v24 = vpop.f32.mrf.mxu0  ;;  %v402_v26 = vpop.f32.mrf.mxu1 }
 0x126   :  { %v406_v25 = vmax.f32 %v361_v20, 0.0  ;;  %v413_v27 = vmul.f32 %v410_v15, %v405_v19  ;;  %v415_v28 = vmul.f32 %v412_v17, %v407_v23 }
 0x127   :  { %v363_v29 = vpop.f32.mrf.mxu0  ;;  %v403_v31 = vpop.f32.mrf.mxu1 }
 0x128   :  { %v414_v30 = vmul.f32 %v411_v21, %v406_v25  ;;  %v418_v32 = vpack.c.bf16 %v415_v28, %v415_v28  ;;  %v416_v34 = vpack.c.bf16 %v413_v27, %v413_v27 }
 0x12a   :  { %v417_v33 = vpack.c.bf16 %v414_v30, %v414_v30  ;;  %827 = vmatmul.mubr.bf16.vlgmr.msra.gmra.mxu1 %v418_v32 }
 0x12c   :  { %650 = vmatprep.mubr.bf16.mxu0 %v417_v33 }
 0x12d   :  { %651 = vmatmul.mubr.bf16.vlgmr.msra.gmra.mxu0 %v416_v34 }
 0x1ea   :  { %v692_v35 = vpop.f32.mrf.mxu1 }
 0x1ec   :  { %v828_v37 = vpop.f32.mrf.mxu1 }
 0x1ed   :  { %v795_v36 = vpop.f32.mrf.mxu0 }
 0x1ee   :  { %v695_v40 = vpop.f32.mrf.mxu1 }
 0x1ef   :  { %v796_v39 = vpop.f32.mrf.mxu0 }
 0x1f0   :  { %v797_v41 = vadd.f32 %v796_v39, %v795_v36  ;;  %v829_v43 = vpop.f32.mrf.mxu1 }
 0x1f1   :  { %v798_v42 = vpop.f32.mrf.mxu0 }
 0x1f2   :  { %v653_v44 = vadd.f32 %v797_v41, %v754_v38 }
 0x1f3   :  { %v799_v45 = vpop.f32.mrf.mxu0 }
 0x1f4   :  { %v693_v46 = vadd.f32 %v692_v35, %v653_v44 }
 0x1f6   :  { %698 = vst [vmem:[#allocation10] sm:$0xff] %v693_v46 }
 0x1f7   :  { %1002 = shalt.err (!%p999_p10)
}
 0x1f8   :  { %708 = dma.vmem_to_hbm [thread:$0]  %s706_s21, 128, %s1107_s6, [#allocation4]  }
 0x1f9   :  { %1017 = dma.done.wait [#allocation4], 128  }
 0x1fa   :  { %1018 = vsyncadd [#allocation4], 4294967168 }
 0x1fb   :  { %712 = vsyncpa [#allocation3], 1 }
 0x1fc   :  { %713 = vsyncpa [#allocation6], 1 }
 0x1fd   :  { %714 = vsyncpa [#allocation9], 1 }
 0x1fe   :  { %715 = vsyncpa [#allocation4], 1 }

</bundles_post_ra>
